<compile_context>
chip_gen: v6e
topology: v6e:2x2x1
jax: 0.10.0
libtpu: 0.0.40
codegen_flags: <defaults>
</compile_context>

<pallas_src>
import numpy as np
import jax
import jax.numpy as jnp
from jax import lax
from jax.experimental import pallas as pl
from jax.experimental.pallas import tpu as pltpu


# ----------------------------- helpers ---------------------------------------


def _round_up(n, m):
    return ((n + m - 1) // m) * m


def extract_patches(x, k, s):
    """im2col: x (N, H, W, C) -> patches (N*Ho*Wo, k*k*C), feature order (di, dj, c)."""
    N, H, W, C = x.shape
    Ho = (H - k) // s + 1
    Wo = (W - k) // s + 1
    cols = []
    for di in range(k):
        for dj in range(k):
            cols.append(x[:, di:di + s * (Ho - 1) + 1:s, dj:dj + s * (Wo - 1) + 1:s, :])
    p = jnp.stack(cols, axis=3)  # (N, Ho, Wo, k*k, C)
    return p.reshape(N * Ho * Wo, k * k * C), Ho, Wo


# ----------------------------- Pallas kernels --------------------------------


def conv_block_kernel(p_ref, w_ref, b_ref, scale_ref, shift_ref, o_ref):
    """One DQNConvBlock + outer F.relu on an im2col row tile.

    p_ref:     (TR, k*k*Cin)  bf16 patches
    w_ref:     (k*k*Cin, Cout) bf16
    b_ref, scale_ref, shift_ref: (1, Cout) f32
    o_ref:     (TR, Cout) bf16
    """
    y = jnp.dot(p_ref[...], w_ref[...], preferred_element_type=jnp.float32)
    y = y + b_ref[...]                                # conv bias
    y = jnp.maximum(y, 0.0)                           # DQNConvBlock ReLU
    y = y * scale_ref[...] + shift_ref[...]           # BatchNorm2d (inference, folded)
    o_ref[...] = jnp.maximum(y, 0.0).astype(o_ref.dtype)  # outer F.relu


def fc_head_kernel(x_ref, w1_ref, b1_ref, w2_ref, b2_ref, o_ref):
    """fc1 -> ReLU -> fc2 on a batch-row tile (fc2 output is lane-padded to 128)."""
    h = jnp.dot(x_ref[...], w1_ref[...], preferred_element_type=jnp.float32) + b1_ref[...]
    h = jnp.maximum(h, 0.0)
    o = jnp.dot(h.astype(w2_ref.dtype), w2_ref[...],
                preferred_element_type=jnp.float32) + b2_ref[...]
    o_ref[...] = o.astype(o_ref.dtype)


def _rowwise_pallas_call(kernel_body, row_arg, resident_args, out_features, *,
                         flops, out_dtype=jnp.float32, block_rows=512):
    """Launch `kernel_body` with a grid over rows of `row_arg`; `resident_args`
    (all 2-D) stay VMEM-resident across grid steps."""
    R, F = row_arg.shape
    tr = min(block_rows, _round_up(max(R, 1), 16))     # sublane-aligned row tile
    rp = _round_up(R, tr)
    if rp != R:
        row_arg = jnp.pad(row_arg, ((0, rp - R), (0, 0)))
    grid = (rp // tr,)

    bytes_accessed = int(row_arg.size * row_arg.dtype.itemsize
                         + sum(a.size * a.dtype.itemsize for a in resident_args)
                         + rp * out_features * np.dtype(out_dtype).itemsize)

    out = pl.pallas_call(
        kernel_body,
        out_shape=jax.ShapeDtypeStruct((rp, out_features), out_dtype),
        grid_spec=pltpu.PrefetchScalarGridSpec(
            num_scalar_prefetch=0,
            grid=grid,
            in_specs=[pl.BlockSpec((tr, F), lambda i: (i, 0))]
                     + [pl.BlockSpec(a.shape, lambda i: (0, 0)) for a in resident_args],
            out_specs=pl.BlockSpec((tr, out_features), lambda i: (i, 0)),
        ),
        compiler_params=pltpu.CompilerParams(dimension_semantics=("parallel",)),
        cost_estimate=pl.CostEstimate(flops=int(flops), transcendentals=0,
                                      bytes_accessed=bytes_accessed),
    )(row_arg, *resident_args)
    return out[:R]


# ----------------------------- forward pass ----------------------------------


def qnetwork_conv_forward(x_nchw, params, output_size):
    """Forward pass of QNetworkConv (inference semantics)."""
    x = jnp.transpose(x_nchw, (0, 2, 3, 1)).astype(jnp.bfloat16)   # NHWC, bf16 MXU operands
    N = x.shape[0]

    for layer in params["conv"]:
        p, ho, wo = extract_patches(x, layer["k"], layer["s"])
        cout = layer["w"].shape[1]
        flops = 2 * p.shape[0] * p.shape[1] * cout
        y = _rowwise_pallas_call(
            conv_block_kernel, p,
            (layer["w"], layer["b"], layer["scale"], layer["shift"]),
            cout, flops=flops, out_dtype=jnp.bfloat16)
        x = y.reshape(N, ho, wo, cout)

    # torch.flatten on NCHW => channel-major flatten; transpose back for parity.
    flat = jnp.transpose(x, (0, 3, 1, 2)).reshape(N, -1)

    fc = params["fc"]
    hidden = fc["w1"].shape[1]
    out_pad = fc["w2"].shape[1]
    flops = 2 * N * (flat.shape[1] * hidden + hidden * out_pad)
    out = _rowwise_pallas_call(
        fc_head_kernel, flat,
        (fc["w1"], fc["b1"], fc["w2"], fc["b2"]),
        out_pad, flops=flops, out_dtype=jnp.float32)
    return out[:, :output_size]


# ----------------------------- params & reference ----------------------------


def init_params(key, in_channels, spatial_size, output_size, hidden=512, eps=1e-5):
    """Deterministic init mirroring PyTorch defaults; conv weights stored flattened as
    (k*k*Cin, Cout) in (di, dj, cin) order; matmul weights stored in bf16."""
    H, W = spatial_size
    conv_defs = [(in_channels, 32, 8, 4), (32, 64, 4, 2), (64, 64, 3, 1)]
    keys = jax.random.split(key, 6 * len(conv_defs) + 4)
    ki = iter(keys)

    conv_params = []
    h, w = H, W
    for cin, cout, k, s in conv_defs:
        fan_in = k * k * cin
        bound = 1.0 / (fan_in ** 0.5)
        wmat = jax.random.uniform(next(ki), (fan_in, cout), jnp.float32, -bound, bound)
        b = jax.random.uniform(next(ki), (1, cout), jnp.float32, -bound, bound)
        # BatchNorm (inference) with non-trivial running stats, folded to scale/shift.
        gamma = jax.random.uniform(next(ki), (1, cout), jnp.float32, 0.5, 1.5)
        beta = 0.1 * jax.random.normal(next(ki), (1, cout), jnp.float32)
        mean = 0.1 * jax.random.normal(next(ki), (1, cout), jnp.float32)
        var = jax.random.uniform(next(ki), (1, cout), jnp.float32, 0.5, 1.5)
        scale = gamma / jnp.sqrt(var + eps)
        shift = beta - mean * scale
        conv_params.append(dict(k=k, s=s, w=wmat.astype(jnp.bfloat16),
                                b=b, scale=scale, shift=shift))
        h = (h - k) // s + 1
        w = (w - k) // s + 1

    conv_out = 64 * h * w
    bound1 = 1.0 / (conv_out ** 0.5)
    w1 = jax.random.uniform(next(ki), (conv_out, hidden), jnp.float32, -bound1, bound1)
    b1 = jax.random.uniform(next(ki), (1, hidden), jnp.float32, -bound1, bound1)

    bound2 = 1.0 / (hidden ** 0.5)
    out_pad = _round_up(max(output_size, 1), 128)      # lane-dense final store
    w2 = jnp.zeros((hidden, out_pad), jnp.float32).at[:, :output_size].set(
        jax.random.uniform(next(ki), (hidden, output_size), jnp.float32, -bound2, bound2))
    b2 = jnp.zeros((1, out_pad), jnp.float32).at[:, :output_size].set(
        jax.random.uniform(next(ki), (1, output_size), jnp.float32, -bound2, bound2))

    fc = dict(w1=w1.astype(jnp.bfloat16), b1=b1, w2=w2.astype(jnp.bfloat16), b2=b2)
    return dict(conv=conv_params, fc=fc)


def reference_forward(x_nchw, params, output_size):
    """Pure-JAX reference (lax.conv_general_dilated) with matching bf16 operand casts."""
    x = jnp.transpose(x_nchw, (0, 2, 3, 1)).astype(jnp.bfloat16)
    for layer in params["conv"]:
        k, s = layer["k"], layer["s"]
        cin = x.shape[-1]
        cout = layer["w"].shape[1]
        w_hwio = layer["w"].reshape(k, k, cin, cout)
        y = lax.conv_general_dilated(
            x, w_hwio, window_strides=(s, s), padding="VALID",
            dimension_numbers=("NHWC", "HWIO", "NHWC"),
            preferred_element_type=jnp.float32)
        y = y + layer["b"].reshape(1, 1, 1, cout)
        y = jnp.maximum(y, 0.0)
        y = y * layer["scale"].reshape(1, 1, 1, cout) + layer["shift"].reshape(1, 1, 1, cout)
        y = jnp.maximum(y, 0.0)
        x = y.astype(jnp.bfloat16)

    N = x.shape[0]
    flat = jnp.transpose(x, (0, 3, 1, 2)).reshape(N, -1)
    fc = params["fc"]
    h = jnp.maximum(jnp.dot(flat, fc["w1"], preferred_element_type=jnp.float32) + fc["b1"], 0.0)
    out = jnp.dot(h.astype(jnp.bfloat16), fc["w2"],
                  preferred_element_type=jnp.float32) + fc["b2"]
    return out[:, :output_size]


# ----------------------------- main ------------------------------------------


if __name__ == "__main__":
    batch = 2
    in_channels = 4
    spatial = (36, 36)   # smallest spatial size valid for k=8/s=4, k=4/s=2, k=3/s=1
    output_size = 4

    key = jax.random.PRNGKey(0)
    k_params, k_x = jax.random.split(key)

    params = init_params(k_params, in_channels, spatial, output_size)
    x = jax.random.normal(k_x, (batch, in_channels) + spatial, dtype=jnp.float32)

    out = qnetwork_conv_forward(x, params, output_size)
    out = jax.block_until_ready(out)

    ref = reference_forward(x, params, output_size)
    assert out.shape == (batch, output_size), f"bad output shape {out.shape}"
    assert jnp.allclose(out, ref, atol=5e-3, rtol=5e-3), "Pallas kernel mismatch vs reference"

    print("KERNEL_OK")
</pallas_src>

<mosaic_0001>
module attributes {stable_mosaic.version = 11 : i64} {
  func.func @conv_block_kernel(%arg0: i32, %arg1: memref<128x256xbf16, #tpu.memory_space<vmem>>, %arg2: memref<256x32xbf16, #tpu.memory_space<vmem>>, %arg3: memref<1x32xf32, #tpu.memory_space<vmem>>, %arg4: memref<1x32xf32, #tpu.memory_space<vmem>>, %arg5: memref<1x32xf32, #tpu.memory_space<vmem>>, %arg6: memref<128x32xbf16, #tpu.memory_space<vmem>>) attributes {dimension_semantics = [#tpu.dimension_semantics<parallel>], iteration_bounds = array<i64: 1>, scalar_prefetch = 0 : i64, scratch_operands = 0 : i64, tpu.core_type = #tpu.core_type<tc>, window_params = [{transform_indices = @transform_0, window_bounds = array<i64: 128, 256>}, {pipeline_mode = #tpu.pipeline_mode<synchronous>, transform_indices = @transform_1, window_bounds = array<i64: 256, 32>}, {pipeline_mode = #tpu.pipeline_mode<synchronous>, transform_indices = @transform_2, window_bounds = array<i64: 1, 32>}, {pipeline_mode = #tpu.pipeline_mode<synchronous>, transform_indices = @transform_3, window_bounds = array<i64: 1, 32>}, {pipeline_mode = #tpu.pipeline_mode<synchronous>, transform_indices = @transform_4, window_bounds = array<i64: 1, 32>}, {transform_indices = @transform_5, window_bounds = array<i64: 128, 32>}]} {
    %c0 = arith.constant 0 : index
    %c0_0 = arith.constant 0 : index
    %0 = vector.load %arg1[%c0, %c0_0] : memref<128x256xbf16, #tpu.memory_space<vmem>>, vector<128x256xbf16>
    %c0_1 = arith.constant 0 : index
    %c0_2 = arith.constant 0 : index
    %1 = vector.load %arg2[%c0_1, %c0_2] : memref<256x32xbf16, #tpu.memory_space<vmem>>, vector<256x32xbf16>
    %cst = arith.constant dense<0.000000e+00> : vector<128x32xf32>
    %2 = tpu.matmul %0, %1, %cst {dimension_numbers = #tpu.dot_dimension_numbers<[1], [0], [0], [1], [0, 0, 1, 1], [], []>} : vector<128x256xbf16>, vector<256x32xbf16>, vector<128x32xf32> -> vector<128x32xf32>
    %c0_3 = arith.constant 0 : index
    %c0_4 = arith.constant 0 : index
    %3 = vector.load %arg3[%c0_3, %c0_4] : memref<1x32xf32, #tpu.memory_space<vmem>>, vector<1x32xf32>
    %4 = vector.broadcast %3 : vector<1x32xf32> to vector<128x32xf32>
    %5 = arith.addf %2, %4 : vector<128x32xf32>
    %cst_5 = arith.constant 0.000000e+00 : f32
    %6 = vector.broadcast %cst_5 : f32 to vector<128x32xf32>
    %7 = arith.maximumf %5, %6 : vector<128x32xf32>
    %c0_6 = arith.constant 0 : index
    %c0_7 = arith.constant 0 : index
    %8 = vector.load %arg4[%c0_6, %c0_7] : memref<1x32xf32, #tpu.memory_space<vmem>>, vector<1x32xf32>
    %9 = vector.broadcast %8 : vector<1x32xf32> to vector<128x32xf32>
    %10 = arith.mulf %7, %9 : vector<128x32xf32>
    %c0_8 = arith.constant 0 : index
    %c0_9 = arith.constant 0 : index
    %11 = vector.load %arg5[%c0_8, %c0_9] : memref<1x32xf32, #tpu.memory_space<vmem>>, vector<1x32xf32>
    %12 = vector.broadcast %11 : vector<1x32xf32> to vector<128x32xf32>
    %13 = arith.addf %10, %12 : vector<128x32xf32>
    %cst_10 = arith.constant 0.000000e+00 : f32
    %14 = vector.broadcast %cst_10 : f32 to vector<128x32xf32>
    %15 = arith.maximumf %13, %14 : vector<128x32xf32>
    %16 = arith.truncf %15 : vector<128x32xf32> to vector<128x32xbf16>
    %c0_11 = arith.constant 0 : index
    %c0_12 = arith.constant 0 : index
    %17 = vector.load %arg6[%c0_11, %c0_12] : memref<128x32xbf16, #tpu.memory_space<vmem>>, vector<128x32xbf16>
    tpu.vector_store %arg6[%c0_11, %c0_12], %16 {strides = array<i32>} : memref<128x32xbf16, #tpu.memory_space<vmem>>, vector<128x32xbf16>,
    return
  }
  func.func @transform_0(%arg0: i32) -> (i32, i32) {
    %c0_i32 = arith.constant 0 : i32
    %c0_i32_0 = arith.constant 0 : i32
    return %arg0, %c0_i32 : i32, i32
  }
  func.func @transform_1(%arg0: i32) -> (i32, i32) {
    %c0_i32 = arith.constant 0 : i32
    %c0_i32_0 = arith.constant 0 : i32
    %c0_i32_1 = arith.constant 0 : i32
    return %c0_i32, %c0_i32_0 : i32, i32
  }
  func.func @transform_2(%arg0: i32) -> (i32, i32) {
    %c0_i32 = arith.constant 0 : i32
    %c0_i32_0 = arith.constant 0 : i32
    %c0_i32_1 = arith.constant 0 : i32
    return %c0_i32, %c0_i32_0 : i32, i32
  }
  func.func @transform_3(%arg0: i32) -> (i32, i32) {
    %c0_i32 = arith.constant 0 : i32
    %c0_i32_0 = arith.constant 0 : i32
    %c0_i32_1 = arith.constant 0 : i32
    return %c0_i32, %c0_i32_0 : i32, i32
  }
  func.func @transform_4(%arg0: i32) -> (i32, i32) {
    %c0_i32 = arith.constant 0 : i32
    %c0_i32_0 = arith.constant 0 : i32
    %c0_i32_1 = arith.constant 0 : i32
    return %c0_i32, %c0_i32_0 : i32, i32
  }
  func.func @transform_5(%arg0: i32) -> (i32, i32) {
    %c0_i32 = arith.constant 0 : i32
    %c0_i32_0 = arith.constant 0 : i32
    return %arg0, %c0_i32 : i32, i32
  }
}

</mosaic_0001>

<bundles_post_ra>
// kernel: tpu_custom_call.1
= control target key start
LH: loop header
LB: loop body
LE: loop exit
PB: predicated region body
PF: predicated region fallthrough
CT: control target
= control target key end

     0   :  { %vm491_vm0 = vcmask 257024   ;;  %s952_s1 = inlined_call_operand.vmem [shape: bf16[256,32], index: 1, kind: input, shape index: {}]   ;;  %s953_s0 = inlined_call_operand.vmem [shape: bf16[128,256], index: 0, kind: input, shape index: {}]   ;;  %s954_s2 = inlined_call_operand.vmem [shape: f32[1,32], index: 2, kind: input, shape index: {}]   ;;  %s955_s3 = inlined_call_operand.vmem [shape: f32[1,32], index: 3, kind: input, shape index: {}]   ;;  %s956_s4 = inlined_call_operand.vmem [shape: f32[1,32], index: 4, kind: input, shape index: {}]   ;;  %s957_s5 = inlined_call_operand.vmem [shape: bf16[128,32], index: 5, kind: output, shape index: {}]  }
   0x1   :  { %v659_v0 = vld [vmem:[%s952_s1 + $0x78] sm:$0xff]   ;;  %v661_v2 = vld [vmem:[%s952_s1 + $0x70] sm:$0xff]   ;;  %v663_v4 = vld [vmem:[%s952_s1 + $0x68] sm:$0xff]  }
   0x2   :  { %v660_v1 = vld [vmem:[%s952_s1 + $0x38] sm:$0xff]   ;;  %579 = vmatprep.subr.bf16.mxu0 %v659_v0  ;;  %643 = vmatprep.subr.bf16.mxu1 %v659_v0  ;;  %v662_v3 = vld [vmem:[%s952_s1 + $0x30] sm:$0xff]   ;;  %v664_v5 = vld [vmem:[%s952_s1 + $0x28] sm:$0xff]  }
   0x3   :  { %580 = vmatpush3.bf16.msra.mxu0 %v660_v1  ;;  %651 = vmatpush3.bf16.msra.mxu1 %v660_v1  ;;  %v665_v6 = vld [vmem:[%s952_s1 + $0x60] sm:$0xff]   ;;  %v667_v8 = vld [vmem:[%s952_s1 + $0x58] sm:$0xff]   ;;  %v669_v10 = vld [vmem:[%s952_s1 + $0x50] sm:$0xff]  }
   0x4   :  { %581 = vmatprep.subr.bf16.mxu0 %v661_v2  ;;  %644 = vmatprep.subr.bf16.mxu1 %v661_v2  ;;  %v666_v7 = vld [vmem:[%s952_s1 + $0x20] sm:$0xff]   ;;  %v668_v9 = vld [vmem:[%s952_s1 + $0x18] sm:$0xff]   ;;  %v670_v13 = vld [vmem:[%s952_s1 + $0x10] sm:$0xff]  }
   0x5   :  { %v677_v11 = vld [vmem:[%s953_s0 + $0x4] ss:$8 sps:$4 sm:$0xff]   ;;  %v675_v18 = vld [vmem:[%s953_s0] ss:$8 sps:$4 sm:$0xff]   ;;  %v681_v20 = vld [vmem:[%s953_s0 + $0x14] ss:$8 sps:$4 sm:$0xff]  }
   0x6   :  { %v680_v12 = vld [vmem:[%s953_s0 + $0x44] ss:$8 sps:$4 sm:$0xff]   ;;  %284 = vmatprep.mubr.bf16.mxu0 %v677_v11  ;;  %v678_v19 = vld [vmem:[%s953_s0 + $0x40] ss:$8 sps:$4 sm:$0xff]   ;;  %v683_v21 = vld [vmem:[%s953_s0 + $0x54] ss:$8 sps:$4 sm:$0xff]  }
   0x7   :  { %582 = vmatpush3.bf16.msra.mxu0 %v662_v3  ;;  %652 = vmatpush3.bf16.msra.mxu1 %v662_v3  ;;  %v671_v14 = vld [vmem:[%s952_s1 + $0x48] sm:$0xff]   ;;  %v673_v16 = vld [vmem:[%s952_s1 + $0x40] sm:$0xff]   ;;  %v685_v22 = vld [vmem:[%s953_s0 + $0x10] ss:$8 sps:$4 sm:$0xff]  }
   0x8   :  { %583 = vmatprep.subr.bf16.mxu0 %v663_v4  ;;  %645 = vmatprep.subr.bf16.mxu1 %v663_v4  ;;  %v672_v15 = vld [vmem:[%s952_s1 + $0x8] sm:$0xff]   ;;  %v674_v17 = vld [vmem:[%s952_s1] sm:$0xff]   ;;  %v686_v23 = vld [vmem:[%s953_s0 + $0x50] ss:$8 sps:$4 sm:$0xff]  }
   0x9   :  { %316 = vmatprep.mubr.bf16.mxu1 %v680_v12  ;;  %v687_v24 = vld [vmem:[%s953_s0 + $0x24] ss:$8 sps:$4 sm:$0xff]   ;;  %v691_v26 = vld [vmem:[%s953_s0 + $0x20] ss:$8 sps:$4 sm:$0xff]   ;;  %v693_v28 = vld [vmem:[%s953_s0 + $0x34] ss:$8 sps:$4 sm:$0xff]  }
   0xa   :  { %v689_v25 = vld [vmem:[%s953_s0 + $0x64] ss:$8 sps:$4 sm:$0xff]   ;;  %v692_v27 = vld [vmem:[%s953_s0 + $0x60] ss:$8 sps:$4 sm:$0xff]   ;;  %v695_v29 = vld [vmem:[%s953_s0 + $0x74] ss:$8 sps:$4 sm:$0xff]  }
   0xb   :  { %584 = vmatpush3.bf16.msra.mxu0 %v664_v5  ;;  %653 = vmatpush3.bf16.msra.mxu1 %v664_v5  ;;  %v697_v30 = vld [vmem:[%s953_s0 + $0x30] ss:$8 sps:$4 sm:$0xff]   ;;  %v828_v34 = vld [vmem:[%s954_s2] ss:$0 sm:$0xff] }
   0xc   :  { %585 = vmatprep.subr.bf16.mxu0 %v665_v6  ;;  %646 = vmatprep.subr.bf16.mxu1 %v665_v6  ;;  %v698_v31 = vld [vmem:[%s953_s0 + $0x70] ss:$8 sps:$4 sm:$0xff]   ;;  %v835_v43 = vld [vmem:[%s955_s3] ss:$0 sm:$0xff] }
   0xd   :  { %v840_v50 = vld [vmem:[%s956_s4] ss:$0 sm:$0xff] }
   0xf   :  { %586 = vmatpush3.bf16.msra.mxu0 %v666_v7  ;;  %654 = vmatpush3.bf16.msra.mxu1 %v666_v7 }
  0x10   :  { %587 = vmatprep.subr.bf16.mxu0 %v667_v8  ;;  %647 = vmatprep.subr.bf16.mxu1 %v667_v8 }
  0x13   :  { %588 = vmatpush3.bf16.msra.mxu0 %v668_v9  ;;  %655 = vmatpush3.bf16.msra.mxu1 %v668_v9 }
  0x14   :  { %589 = vmatprep.subr.bf16.mxu0 %v669_v10  ;;  %648 = vmatprep.subr.bf16.mxu1 %v669_v10 }
  0x17   :  { %590 = vmatpush3.bf16.msra.mxu0 %v670_v13  ;;  %656 = vmatpush3.bf16.msra.mxu1 %v670_v13 }
  0x18   :  { %591 = vmatprep.subr.bf16.mxu0 %v671_v14  ;;  %649 = vmatprep.subr.bf16.mxu1 %v671_v14 }
  0x1b   :  { %592 = vmatpush3.bf16.msra.mxu0 %v672_v15  ;;  %657 = vmatpush3.bf16.msra.mxu1 %v672_v15 }
  0x1c   :  { %593 = vmatprep.subr.bf16.mxu0 %v673_v16  ;;  %650 = vmatprep.subr.bf16.mxu1 %v673_v16 }
  0x1f   :  { %594 = vmatpush3.bf16.msra.mxu0 %v674_v17  ;;  %658 = vmatpush3.bf16.msra.mxu1 %v674_v17 }
  0x22   :  { %285 = vmatmul.mubr.bf16.vlgmr.msra.gmra.mxu0 %v675_v18  ;;  %317 = vmatmul.mubr.bf16.vlgmr.msra.gmra.mxu1 %v678_v19 }
  0x23   :  { %292 = vmatprep.mubr.bf16.mxu0 %v681_v20  ;;  %324 = vmatprep.mubr.bf16.mxu1 %v683_v21 }
  0x2a   :  { %293 = vmatmul.mubr.bf16.gmra.mxu0 %v685_v22  ;;  %325 = vmatmul.mubr.bf16.gmra.mxu1 %v686_v23 }
  0x2b   :  { %300 = vmatprep.mubr.bf16.mxu0 %v687_v24  ;;  %332 = vmatprep.mubr.bf16.mxu1 %v689_v25 }
  0x32   :  { %301 = vmatmul.mubr.bf16.gmra.mxu0 %v691_v26  ;;  %333 = vmatmul.mubr.bf16.gmra.mxu1 %v692_v27 }
  0x33   :  { %308 = vmatprep.mubr.bf16.mxu0 %v693_v28  ;;  %340 = vmatprep.mubr.bf16.mxu1 %v695_v29 }
  0x3a   :  { %309 = vmatmul.mubr.bf16.gmra.mxu0 %v697_v30  ;;  %341 = vmatmul.mubr.bf16.gmra.mxu1 %v698_v31 }
  0xe2   :  { %v595_v32 = vpop.f32.mrf.mxu0  ;;  %v619_v33 = vpop.f32.mrf.mxu1 }
  0xe4   :  { %v596_v35 = vpop.f32.mrf.mxu0  ;;  %v620_v36 = vpop.f32.mrf.mxu1 }
  0xe5   :  { %v597_v37 = vadd.f32 %v596_v35, %v595_v32  ;;  %v621_v38 = vadd.f32 %v620_v36, %v619_v33 }
  0xe6   :  { %v598_v39 = vpop.f32.mrf.mxu0  ;;  %v622_v40 = vpop.f32.mrf.mxu1 }
  0xe7   :  { %v287_v41 = vadd.f32 %v597_v37, %v828_v34  ;;  %v319_v42 = vadd.f32 %v621_v38, %v828_v34 }
  0xe8   :  { %v599_v44 = vpop.f32.mrf.mxu0  ;;  %v623_v45 = vpop.f32.mrf.mxu1 }
  0xe9   :  { %v349_v46 = vmax.f32 %v287_v41, 0.0  ;;  %v357_v47 = vmax.f32 %v319_v42, 0.0  ;;  %v600_v48 = vadd.f32 %v599_v44, %v598_v39  ;;  %v624_v49 = vadd.f32 %v623_v45, %v622_v40 }
  0xea   :  { %v601_v51 = vpop.f32.mrf.mxu0  ;;  %v625_v52 = vpop.f32.mrf.mxu1 }
  0xeb   :  { %v372_v53 = vmul.f32 %v835_v43, %v349_v46  ;;  %v380_v54 = vmul.f32 %v835_v43, %v357_v47  ;;  %v290_v55 = vadd.f32 %v600_v48, %v828_v34  ;;  %v322_v56 = vadd.f32 %v624_v49, %v828_v34 }
  0xec   :  { %v602_v57 = vpop.f32.mrf.mxu0  ;;  %v626_v58 = vpop.f32.mrf.mxu1 }
  0xed   :  { %v395_v59 = vadd.f32 %v840_v50, %v372_v53  ;;  %v403_v60 = vadd.f32 %v840_v50, %v380_v54  ;;  %v350_v61 = vmax.f32 %v290_v55, 0.0  ;;  %v358_v62 = vmax.f32 %v322_v56, 0.0 }
  0xee   :  { %v603_v63 = vadd.f32 %v602_v57, %v601_v51  ;;  %v627_v0 = vadd.f32 %v626_v58, %v625_v52  ;;  %v604_v1 = vpop.f32.mrf.mxu0  ;;  %v628_v2 = vpop.f32.mrf.mxu1 }
  0xef   :  { %v411_v3 = vmax.f32 %v395_v59, 0.0  ;;  %v419_v4 = vmax.f32 %v403_v60, 0.0  ;;  %v373_v5 = vmul.f32 %v835_v43, %v350_v61  ;;  %v381_v6 = vmul.f32 %v835_v43, %v358_v62 }
  0xf0   :  { %v295_v7 = vadd.f32 %v603_v63, %v828_v34  ;;  %v327_v8 = vadd.f32 %v627_v0, %v828_v34  ;;  %v605_v9 = vpop.f32.mrf.mxu0  ;;  %v629_v10 = vpop.f32.mrf.mxu1 }
  0xf1   :  { %v563_v11 = vpack.c.bf16 %v411_v3, %v411_v3  ;;  %v571_v12 = vpack.c.bf16 %v419_v4, %v419_v4  ;;  %v396_v13 = vadd.f32 %v840_v50, %v373_v5  ;;  %v404_v14 = vadd.f32 %v840_v50, %v381_v6 }
  0xf2   :  { %v351_v15 = vmax.f32 %v295_v7, 0.0  ;;  %v359_v16 = vmax.f32 %v327_v8, 0.0  ;;  %v606_v17 = vadd.f32 %v605_v9, %v604_v1  ;;  %v630_v18 = vadd.f32 %v629_v10, %v628_v2  ;;  %v607_v19 = vpop.f32.mrf.mxu0  ;;  %v631_v20 = vpop.f32.mrf.mxu1 }
  0xf3   :  { %492 = vst.msk [vmem:[%s957_s5] sm:$0xf] %vm491_vm0, %v563_v11  ;;  %500 = vst.msk [vmem:[%s957_s5 + $0x20] sm:$0xf] %vm491_vm0, %v571_v12  ;;  %v412_v21 = vmax.f32 %v396_v13, 0.0  ;;  %v420_v22 = vmax.f32 %v404_v14, 0.0 }
  0xf4   :  { %v374_v23 = vmul.f32 %v835_v43, %v351_v15  ;;  %v382_v24 = vmul.f32 %v835_v43, %v359_v16  ;;  %v298_v25 = vadd.f32 %v606_v17, %v828_v34  ;;  %v330_v26 = vadd.f32 %v630_v18, %v828_v34  ;;  %v608_v27 = vpop.f32.mrf.mxu0  ;;  %v632_v28 = vpop.f32.mrf.mxu1 }
  0xf5   :  { %v564_v29 = vpack.c.bf16 %v412_v21, %v412_v21  ;;  %v572_v30 = vpack.c.bf16 %v420_v22, %v420_v22  ;;  %v609_v31 = vadd.f32 %v608_v27, %v607_v19  ;;  %v633_v32 = vadd.f32 %v632_v28, %v631_v20 }
  0xf6   :  { %v397_v33 = vadd.f32 %v840_v50, %v374_v23  ;;  %v405_v35 = vadd.f32 %v840_v50, %v382_v24  ;;  %v352_v36 = vmax.f32 %v298_v25, 0.0  ;;  %v360_v37 = vmax.f32 %v330_v26, 0.0  ;;  %v610_v38 = vpop.f32.mrf.mxu0  ;;  %v634_v39 = vpop.f32.mrf.mxu1 }
  0xf7   :  { %493 = vst.msk [vmem:[%s957_s5 + $0x4] sm:$0xf] %vm491_vm0, %v564_v29  ;;  %501 = vst.msk [vmem:[%s957_s5 + $0x24] sm:$0xf] %vm491_vm0, %v572_v30  ;;  %v303_v40 = vadd.f32 %v609_v31, %v828_v34  ;;  %v335_v41 = vadd.f32 %v633_v32, %v828_v34 }
  0xf8   :  { %v413_v42 = vmax.f32 %v397_v33, 0.0  ;;  %v421_v44 = vmax.f32 %v405_v35, 0.0  ;;  %v375_v45 = vmul.f32 %v835_v43, %v352_v36  ;;  %v383_v46 = vmul.f32 %v835_v43, %v360_v37  ;;  %v611_v47 = vpop.f32.mrf.mxu0  ;;  %v635_v48 = vpop.f32.mrf.mxu1 }
  0xf9   :  { %v353_v49 = vmax.f32 %v303_v40, 0.0  ;;  %v361_v51 = vmax.f32 %v335_v41, 0.0  ;;  %v612_v52 = vadd.f32 %v611_v47, %v610_v38  ;;  %v636_v53 = vadd.f32 %v635_v48, %v634_v39 }
  0xfa   :  { %v565_v54 = vpack.c.bf16 %v413_v42, %v413_v42  ;;  %v573_v55 = vpack.c.bf16 %v421_v44, %v421_v44  ;;  %v398_v56 = vadd.f32 %v840_v50, %v375_v45  ;;  %v406_v57 = vadd.f32 %v840_v50, %v383_v46  ;;  %v613_v58 = vpop.f32.mrf.mxu0  ;;  %v637_v59 = vpop.f32.mrf.mxu1 }
  0xfb   :  { %v376_v60 = vmul.f32 %v835_v43, %v353_v49  ;;  %v384_v61 = vmul.f32 %v835_v43, %v361_v51  ;;  %v306_v62 = vadd.f32 %v612_v52, %v828_v34  ;;  %v338_v63 = vadd.f32 %v636_v53, %v828_v34 }
  0xfc   :  { %494 = vst.msk [vmem:[%s957_s5 + $0x8] sm:$0xf] %vm491_vm0, %v565_v54  ;;  %502 = vst.msk [vmem:[%s957_s5 + $0x28] sm:$0xf] %vm491_vm0, %v573_v55  ;;  %v414_v0 = vmax.f32 %v398_v56, 0.0  ;;  %v422_v1 = vmax.f32 %v406_v57, 0.0  ;;  %v614_v2 = vpop.f32.mrf.mxu0  ;;  %v638_v3 = vpop.f32.mrf.mxu1 }
  0xfd   :  { %v399_v4 = vadd.f32 %v840_v50, %v376_v60  ;;  %v407_v5 = vadd.f32 %v840_v50, %v384_v61  ;;  %v354_v6 = vmax.f32 %v306_v62, 0.0  ;;  %v362_v7 = vmax.f32 %v338_v63, 0.0 }
  0xfe   :  { %v566_v8 = vpack.c.bf16 %v414_v0, %v414_v0  ;;  %v574_v9 = vpack.c.bf16 %v422_v1, %v422_v1  ;;  %v615_v10 = vadd.f32 %v614_v2, %v613_v58  ;;  %v639_v11 = vadd.f32 %v638_v3, %v637_v59  ;;  %v616_v12 = vpop.f32.mrf.mxu0  ;;  %v640_v13 = vpop.f32.mrf.mxu1 }
  0xff   :  { %v415_v14 = vmax.f32 %v399_v4, 0.0  ;;  %v423_v15 = vmax.f32 %v407_v5, 0.0  ;;  %v377_v16 = vmul.f32 %v835_v43, %v354_v6  ;;  %v385_v17 = vmul.f32 %v835_v43, %v362_v7 }
 0x100   :  { %495 = vst.msk [vmem:[%s957_s5 + $0xc] sm:$0xf] %vm491_vm0, %v566_v8  ;;  %503 = vst.msk [vmem:[%s957_s5 + $0x2c] sm:$0xf] %vm491_vm0, %v574_v9  ;;  %v311_v18 = vadd.f32 %v615_v10, %v828_v34  ;;  %v343_v19 = vadd.f32 %v639_v11, %v828_v34  ;;  %v617_v20 = vpop.f32.mrf.mxu0  ;;  %v641_v21 = vpop.f32.mrf.mxu1 }
 0x101   :  { %v567_v22 = vpack.c.bf16 %v415_v14, %v415_v14  ;;  %v575_v23 = vpack.c.bf16 %v423_v15, %v423_v15  ;;  %v400_v24 = vadd.f32 %v840_v50, %v377_v16  ;;  %v408_v25 = vadd.f32 %v840_v50, %v385_v17 }
 0x102   :  { %v355_v26 = vmax.f32 %v311_v18, 0.0  ;;  %v363_v27 = vmax.f32 %v343_v19, 0.0  ;;  %v618_v28 = vadd.f32 %v617_v20, %v616_v12  ;;  %v642_v29 = vadd.f32 %v641_v21, %v640_v13 }
 0x103   :  { %496 = vst.msk [vmem:[%s957_s5 + $0x10] sm:$0xf] %vm491_vm0, %v567_v22  ;;  %504 = vst.msk [vmem:[%s957_s5 + $0x30] sm:$0xf] %vm491_vm0, %v575_v23  ;;  %v416_v30 = vmax.f32 %v400_v24, 0.0  ;;  %v424_v31 = vmax.f32 %v408_v25, 0.0 }
 0x104   :  { %v378_v32 = vmul.f32 %v835_v43, %v355_v26  ;;  %v386_v33 = vmul.f32 %v835_v43, %v363_v27  ;;  %v314_v35 = vadd.f32 %v618_v28, %v828_v34  ;;  %v346_v36 = vadd.f32 %v642_v29, %v828_v34 }
 0x105   :  { %v568_v37 = vpack.c.bf16 %v416_v30, %v416_v30  ;;  %v576_v38 = vpack.c.bf16 %v424_v31, %v424_v31 }
 0x106   :  { %v401_v39 = vadd.f32 %v840_v50, %v378_v32  ;;  %v409_v40 = vadd.f32 %v840_v50, %v386_v33  ;;  %v356_v41 = vmax.f32 %v314_v35, 0.0  ;;  %v364_v42 = vmax.f32 %v346_v36, 0.0 }
 0x107   :  { %497 = vst.msk [vmem:[%s957_s5 + $0x14] sm:$0xf] %vm491_vm0, %v568_v37  ;;  %505 = vst.msk [vmem:[%s957_s5 + $0x34] sm:$0xf] %vm491_vm0, %v576_v38 }
 0x108   :  { %v417_v44 = vmax.f32 %v401_v39, 0.0  ;;  %v425_v34 = vmax.f32 %v409_v40, 0.0  ;;  %v379_v45 = vmul.f32 %v835_v43, %v356_v41  ;;  %v387_v46 = vmul.f32 %v835_v43, %v364_v42 }
 0x10a   :  { %v569_v47 = vpack.c.bf16 %v417_v44, %v417_v44  ;;  %v577_v48 = vpack.c.bf16 %v425_v34, %v425_v34  ;;  %v402_v49 = vadd.f32 %v840_v50, %v379_v45  ;;  %v410_v51 = vadd.f32 %v840_v50, %v387_v46 }
 0x10c   :  { %498 = vst.msk [vmem:[%s957_s5 + $0x18] sm:$0xf] %vm491_vm0, %v569_v47  ;;  %506 = vst.msk [vmem:[%s957_s5 + $0x38] sm:$0xf] %vm491_vm0, %v577_v48  ;;  %v418_v52 = vmax.f32 %v402_v49, 0.0  ;;  %v426_v53 = vmax.f32 %v410_v51, 0.0 }
 0x10e   :  { %v570_v54 = vpack.c.bf16 %v418_v52, %v418_v52  ;;  %v578_v43 = vpack.c.bf16 %v426_v53, %v426_v53 }
 0x110   :  { %499 = vst.msk [vmem:[%s957_s5 + $0x1c] sm:$0xf] %vm491_vm0, %v570_v54  ;;  %507 = vst.msk [vmem:[%s957_s5 + $0x3c] sm:$0xf] %vm491_vm0, %v578_v43 }

</bundles_post_ra>
